<compile_context>
chip_gen: v7x
topology: tpu7x:2x2x1
jax: 0.10.0
libtpu: 0.0.40
codegen_flags: <defaults>
</compile_context>

<pallas_src>
import functools

import jax
import jax.numpy as jnp
from jax.experimental import pallas as pl
from jax.experimental.pallas import tpu as pltpu

_LANE = 128
_SUBLANE = 8

# Inputs with (row-padded) row count <= this take the single-block path.
# 8192 rows * 128 * 4 B = 4 MiB f32 per input (<= 16 MiB with double buffers).
_MAX_SINGLE_BLOCK_ROWS = 8192

# Streaming-path tile: (4096, 128) f32 = 2 MiB per block.
_TILE_ROWS = 4096

# Fixed-size VMEM vector accumulator, decoupled from the tile size.
_ACC_ROWS = 512

_VMEM_LIMIT = 32 * 1024 * 1024


def _l1_single_block_kernel(inv_n, t_ref, p_ref, o_ref):
    """One grid step: whole (padded) input is a single VMEM block."""
    diff = jnp.abs(t_ref[...] - p_ref[...]).astype(jnp.float32)
    o_ref[0, 0] = jnp.sum(diff) * inv_n


def _l1_tiled_kernel(t_ref, p_ref, o_ref, acc_ref, *,
                     inv_n, rows, num_tiles, tiles_per_half):
    """Grid = (core-half, row-tile). Fixed VMEM accumulator, epilogue reduce."""
    c = pl.program_id(0)                 # TensorCore ("parallel") axis
    j = pl.program_id(1)                 # row-tile ("arbitrary") reduction axis
    tile_idx = c * tiles_per_half + j
    last_tile = num_tiles - 1
    n_sub = _TILE_ROWS // _ACC_ROWS

    @pl.when(j == 0)
    def _():
        acc_ref[...] = jnp.zeros_like(acc_ref)

    def _chunk_diff(s):
        # Diff/abs in the input dtype (packed bf16 stays packed); one widening
        # cast into the f32 accumulator.
        r0 = s * _ACC_ROWS
        return jnp.abs(
            t_ref[pl.ds(r0, _ACC_ROWS), :] - p_ref[pl.ds(r0, _ACC_ROWS), :]
        ).astype(jnp.float32)

    # Steady state: full, fully in-bounds tiles — pure VPU work, no masking,
    # no per-step cross-lane reduce.
    @pl.when(tile_idx < last_tile)
    def _():
        for s in range(n_sub):
            acc_ref[...] += _chunk_diff(s)

    # The globally-last tile may hang off the end of the (rows, 128) array:
    # out-of-bounds rows hold garbage and MUST be masked.  All decisions here
    # are static (the last tile's start row is a compile-time constant).
    @pl.when(tile_idx == last_tile)
    def _():
        last_start = last_tile * _TILE_ROWS
        for s in range(n_sub):
            g0 = last_start + s * _ACC_ROWS
            if g0 >= rows:
                break                                   # fully out of range
            if g0 + _ACC_ROWS <= rows:
                acc_ref[...] += _chunk_diff(s)          # fully in range
            else:
                valid = rows - g0                       # 1 .. _ACC_ROWS - 1
                row_ids = jax.lax.broadcasted_iota(
                    jnp.int32, (_ACC_ROWS, _LANE), 0)
                acc_ref[...] += jnp.where(row_ids < valid, _chunk_diff(s), 0.0)

    # (When num_tiles is odd the second half gets one dummy trailing step with
    #  tile_idx > last_tile: its DMA is clamped in-bounds by the index_map and
    #  neither accumulate branch fires, so it contributes nothing.)

    @pl.when(j == pl.num_programs(1) - 1)
    def _():
        # One cross-lane (XLU) reduce per core + constant multiply.
        o_ref[0, 0] = jnp.sum(acc_ref[...]) * inv_n


def _pad_flat(x, padded_len):
    if x.shape[0] == padded_len:
        return x
    return jnp.pad(x, (0, padded_len - x.shape[0]))


def l1_loss(target, pred):
    """Mean absolute error over all elements (== torch.nn.functional.l1_loss).

    Returns a float32 scalar (slight API difference vs torch, which returns the
    input dtype for low-precision inputs; f32 is strictly more accurate).
    """
    assert target.shape == pred.shape, "target/pred shape mismatch"
    n = int(target.size)
    assert n > 0, "empty input"
    inv_n = 1.0 / float(n)   # static constant -> free multiply in the kernel

    # Keep HBM-resident data in its original dtype (bf16 stays bf16).
    t_flat = target.reshape(-1)
    p_flat = pred.reshape(-1)

    if n <= _MAX_SINGLE_BLOCK_ROWS * _LANE:
        # ---- small/medium path: one block, one grid step, no pipeline -------
        block_elems = _SUBLANE * _LANE
        padded = ((n + block_elems - 1) // block_elems) * block_elems
        rows = padded // _LANE
        t2 = _pad_flat(t_flat, padded).reshape(rows, _LANE)
        p2 = _pad_flat(p_flat, padded).reshape(rows, _LANE)

        out = pl.pallas_call(
            functools.partial(_l1_single_block_kernel, inv_n),
            out_shape=jax.ShapeDtypeStruct((1, 1), jnp.float32),
            grid=(1,),
            in_specs=[
                pl.BlockSpec((rows, _LANE), lambda i: (0, 0)),
                pl.BlockSpec((rows, _LANE), lambda i: (0, 0)),
            ],
            out_specs=pl.BlockSpec((1, 1), lambda i: (0, 0),
                                   memory_space=pltpu.SMEM),
            compiler_params=pltpu.CompilerParams(
                vmem_limit_bytes=_VMEM_LIMIT),
        )(t2, p2)
        return out.reshape(())

    # ---- large path: 2-core split x tiled streaming reduction ---------------
    # Pad only to the next multiple of 128 (free reshape when n % 128 == 0);
    # partial row-tiles are masked in-kernel instead of being padded out.
    # TODO(synk): for n % 128 != 0 the jnp.pad below still materializes one
    # padded copy of each input; a split main/tail kernel call would avoid it.
    padded = ((n + _LANE - 1) // _LANE) * _LANE
    rows = padded // _LANE
    t2 = _pad_flat(t_flat, padded).reshape(rows, _LANE)
    p2 = _pad_flat(p_flat, padded).reshape(rows, _LANE)

    num_tiles = (rows + _TILE_ROWS - 1) // _TILE_ROWS
    tiles_per_half = (num_tiles + 1) // 2
    last_tile = num_tiles - 1

    def in_map(c, j):
        # Clamp the (possible) dummy trailing step of the second half so its
        # DMA stays in bounds; the kernel skips its accumulation.
        return (jnp.minimum(c * tiles_per_half + j, last_tile), 0)

    kernel = functools.partial(
        _l1_tiled_kernel, inv_n=inv_n, rows=rows,
        num_tiles=num_tiles, tiles_per_half=tiles_per_half)

    partials = pl.pallas_call(
        kernel,
        out_shape=jax.ShapeDtypeStruct((2, 1), jnp.float32),
        grid_spec=pltpu.PrefetchScalarGridSpec(
            num_scalar_prefetch=0,
            grid=(2, tiles_per_half),
            in_specs=[
                pl.BlockSpec((_TILE_ROWS, _LANE), in_map),
                pl.BlockSpec((_TILE_ROWS, _LANE), in_map),
            ],
            out_specs=pl.BlockSpec((1, 1), lambda c, j: (c, 0),
                                   memory_space=pltpu.SMEM),
            scratch_shapes=[pltpu.VMEM((_ACC_ROWS, _LANE), jnp.float32)],
        ),
        compiler_params=pltpu.CompilerParams(
            # Leading axis shards across the 2 TensorCores on v7x; it is a
            # harmless sequential 2-iteration loop on v5e/v6e (1 TC).
            dimension_semantics=("parallel", "arbitrary"),
            vmem_limit_bytes=_VMEM_LIMIT,
        ),
    )(t2, p2)
    return jnp.sum(partials)


if __name__ == "__main__":
    key = jax.random.PRNGKey(0)
    keys = jax.random.split(key, 8)

    # 1) Small NCHW input consistent with the module's usage (single-block path).
    shape = (2, 4, 16, 16)
    target = jax.random.normal(keys[0], shape, dtype=jnp.float32)
    pred = jax.random.normal(keys[1], shape, dtype=jnp.float32)
    loss = jax.block_until_ready(l1_loss(target, pred))
    ref = jnp.mean(jnp.abs(target - pred))
    assert jnp.allclose(loss, ref, rtol=1e-5, atol=1e-6), (loss, ref)

    # 2) Element count not a multiple of 8*128 -> zero-padded tail (small path).
    shape2 = (3, 5, 17, 19)      # 4845 elements
    t2 = jax.random.normal(keys[2], shape2, dtype=jnp.float32)
    p2 = jax.random.normal(keys[3], shape2, dtype=jnp.float32)
    loss2 = jax.block_until_ready(l1_loss(t2, p2))
    ref2 = jnp.mean(jnp.abs(t2 - p2))
    assert jnp.allclose(loss2, ref2, rtol=1e-5, atol=1e-6), (loss2, ref2)

    # 3) Large, 128-aligned f32 input -> tiled path, odd tile count (exercises
    #    the dummy trailing step of the second core half), no padding copy.
    shape3 = (2, 4, 384, 384)    # 1_179_648 elements -> 9216 rows, 3 tiles
    t3 = jax.random.normal(keys[4], shape3, dtype=jnp.float32)
    p3 = jax.random.normal(keys[5], shape3, dtype=jnp.float32)
    loss3 = jax.block_until_ready(l1_loss(t3, p3))
    ref3 = jnp.mean(jnp.abs(t3 - p3))
    assert jnp.allclose(loss3, ref3, rtol=1e-4, atol=1e-4), (loss3, ref3)

    # 4) Large ragged bf16 input -> tiled path with in-kernel masking of the
    #    partial last row-tile and a partially-valid accumulator chunk.
    shape4 = (3, 5, 293, 289)    # 1_270_155 elements (n % 128 == 11)
    t4 = jax.random.normal(keys[6], shape4, dtype=jnp.float32).astype(jnp.bfloat16)
    p4 = jax.random.normal(keys[7], shape4, dtype=jnp.float32).astype(jnp.bfloat16)
    loss4 = jax.block_until_ready(l1_loss(t4, p4))
    ref4 = jnp.mean(jnp.abs(t4.astype(jnp.float32) - p4.astype(jnp.float32)))
    assert jnp.allclose(loss4, ref4, rtol=1e-3, atol=1e-3), (loss4, ref4)

    print("KERNEL_OK")
</pallas_src>

<mosaic_0001>
module attributes {stable_mosaic.version = 11 : i64} {
  func.func @_l1_single_block_kernel(%arg0: i32, %arg1: memref<16x128xf32, #tpu.memory_space<vmem>>, %arg2: memref<16x128xf32, #tpu.memory_space<vmem>>, %arg3: memref<1x1xf32, #tpu.memory_space<smem>>) attributes {dimension_semantics = [#tpu.dimension_semantics<arbitrary>], iteration_bounds = array<i64: 1>, scalar_prefetch = 0 : i64, scratch_operands = 0 : i64, tpu.core_type = #tpu.core_type<tc>, window_params = [{pipeline_mode = #tpu.pipeline_mode<synchronous>, transform_indices = @transform_0, window_bounds = array<i64: 16, 128>}, {pipeline_mode = #tpu.pipeline_mode<synchronous>, transform_indices = @transform_1, window_bounds = array<i64: 16, 128>}, {transform_indices = @transform_2, window_bounds = array<i64: 1, 1>}]} {
    %c0 = arith.constant 0 : index
    %c0_0 = arith.constant 0 : index
    %0 = vector.load %arg1[%c0, %c0_0] : memref<16x128xf32, #tpu.memory_space<vmem>>, vector<16x128xf32>
    %c0_1 = arith.constant 0 : index
    %c0_2 = arith.constant 0 : index
    %1 = vector.load %arg2[%c0_1, %c0_2] : memref<16x128xf32, #tpu.memory_space<vmem>>, vector<16x128xf32>
    %2 = arith.subf %0, %1 : vector<16x128xf32>
    %3 = math.absf %2 : vector<16x128xf32>
    %4 = vector.shape_cast %3 : vector<16x128xf32> to vector<1x16x128xf32>
    %cst = arith.constant dense<0.000000e+00> : vector<1xf32>
    %5 = vector.multi_reduction <add>, %4, %cst [1, 2] : vector<1x16x128xf32> to vector<1xf32>
    %6 = vector.shape_cast %5 : vector<1xf32> to vector<1x1x1xf32>
    %7 = vector.extract %6[0, 0, 0] : f32 from vector<1x1x1xf32>
    %cst_3 = arith.constant 4.8828125E-4 : f32
    %8 = arith.mulf %7, %cst_3 : f32
    %c0_4 = arith.constant 0 : index
    %c0_5 = arith.constant 0 : index
    %9 = memref.load %arg3[%c0_4, %c0_5] : memref<1x1xf32, #tpu.memory_space<smem>>
    memref.store %8, %arg3[%c0_4, %c0_5] : memref<1x1xf32, #tpu.memory_space<smem>>
    return
  }
  func.func @transform_0(%arg0: i32) -> (i32, i32) {
    %c0_i32 = arith.constant 0 : i32
    %c0_i32_0 = arith.constant 0 : i32
    %c0_i32_1 = arith.constant 0 : i32
    return %c0_i32, %c0_i32_0 : i32, i32
  }
  func.func @transform_1(%arg0: i32) -> (i32, i32) {
    %c0_i32 = arith.constant 0 : i32
    %c0_i32_0 = arith.constant 0 : i32
    %c0_i32_1 = arith.constant 0 : i32
    return %c0_i32, %c0_i32_0 : i32, i32
  }
  func.func @transform_2(%arg0: i32) -> (i32, i32) {
    %c0_i32 = arith.constant 0 : i32
    %c0_i32_0 = arith.constant 0 : i32
    %c0_i32_1 = arith.constant 0 : i32
    return %c0_i32, %c0_i32_0 : i32, i32
  }
}

</mosaic_0001>

<bundles_post_ra>
// kernel: tpu_custom_call.1
= control target key start
LH: loop header
LB: loop body
LE: loop exit
PB: predicated region body
PF: predicated region fallthrough
CT: control target
= control target key end

     0   :  { %7 = vsyncpa [#allocation3], 0  ;;  %s199_s0 = inlined_call_operand.hbm [shape: f32[16,128], index: 0, kind: input, shape index: {}]   ;;  %s200_s1 = inlined_call_operand.hbm [shape: f32[16,128], index: 1, kind: input, shape index: {}]   ;;  %s201_s2 = inlined_call_operand.hbm [shape: f32[1,1], index: 2, kind: output, shape index: {}]  }
   0x1   :  { %8 = vsyncpa [#allocation6], 0 }
   0x2   :  { %9 = vsyncpa [#allocation4], 0  ;;  %s143_s9 = smov [#allocation2]   ;;  %s83_s13 = scalar_lea.hbm %s199_s0, 256 }
   0x3   :  { %s15_s10 = sshll.u32 %s143_s9, 4  ;;  %p84_p0 = scmp.ne.s32.totalorder %s199_s0, %s83_s13  ;;  %s16_s10 = int_to_ptr.vmem [resolvable:$true] %s15_s10 }
   0x4   :  { %p87_p1 = scmp.lt.u32.totalorder %s83_s13, %s199_s0 }
   0x6   :  { %p89_p2 = pnand %p87_p1, %p84_p0 }
   0x8   :  { %92 = shalt.err (!%p89_p2)
}
   0x9   :  { %s93_s18 = scalar_lea.vmem %s16_s10, 256  ;;  %p98_p4 = scmp.lt.s32.totalorder %s16_s10, %s16_s10 }
   0xa   :  { %p94_p3 = scmp.ne.s32.totalorder %s16_s10, %s93_s18  ;;  %p99_p5 = scmp.lt.s32.totalorder %s93_s18, %s93_s18 }
   0xc   :  { %p100_p6 = por %p99_p5, %p98_p4 }
   0xe   :  { %p101_p7 = pnand %p100_p6, %p94_p3 }
  0x10   :  { %104 = shalt.err (!%p101_p7)
}
  0x11   :  { %s144_s19 = smov 128   ;;  %s145_s20 = smov 8  }
  0x12   :  { %21 = dma.hbm_to_vmem [thread:$0]  %s199_s0, 256, %s16_s10, [#allocation3], %s144_s19, %s144_s19, %s145_s20  }
  0x13   :  { %s146_s23 = smov [#allocation5]   ;;  %s105_s27 = scalar_lea.hbm %s200_s1, 256 }
  0x14   :  { %s27_s24 = sshll.u32 %s146_s23, 4  ;;  %p106_p8 = scmp.ne.s32.totalorder %s200_s1, %s105_s27  ;;  %s28_s24 = int_to_ptr.vmem [resolvable:$true] %s27_s24 }
  0x15   :  { %p109_p9 = scmp.lt.u32.totalorder %s105_s27, %s200_s1 }
  0x17   :  { %p111_p10 = pnand %p109_p9, %p106_p8 }
  0x19   :  { %114 = shalt.err (!%p111_p10)
}
  0x1a   :  { %s115_s4 = scalar_lea.vmem %s28_s24, 256  ;;  %p120_p12 = scmp.lt.s32.totalorder %s28_s24, %s28_s24 }
  0x1b   :  { %p116_p11 = scmp.ne.s32.totalorder %s28_s24, %s115_s4  ;;  %p121_p13 = scmp.lt.s32.totalorder %s115_s4, %s115_s4 }
  0x1d   :  { %p122_p0 = por %p121_p13, %p120_p12 }
  0x1f   :  { %p123_p1 = pnand %p122_p0, %p116_p11 }
  0x21   :  { %126 = shalt.err (!%p123_p1)
}
  0x22   :  { %33 = dma.hbm_to_vmem [thread:$0]  %s200_s1, 256, %s28_s24, [#allocation6], %s144_s19, %s144_s19, %s145_s20  }
  0x23   :  { %137 = dma.done.wait [#allocation3], 256  }
  0x24   :  { %138 = vsyncadd [#allocation3], 4294967040 }
  0x25   :  { %139 = dma.done.wait [#allocation6], 256  }
  0x26   :  { %140 = vsyncadd [#allocation6], 4294967040  ;;  %v40_v0 = vld [vmem:[#allocation2] sm:$0xff]  ;;  %v41_v1 = vld [vmem:[#allocation2 + $0x8] sm:$0xff]  ;;  %s127_s9 = scalar_lea.hbm %s201_s2, 16 }
  0x27   :  { %v42_v2 = vld [vmem:[#allocation5] sm:$0xff]  ;;  %v43_v3 = vld [vmem:[#allocation5 + $0x8] sm:$0xff]  ;;  %p128_p2 = scmp.ne.s32.totalorder %s201_s2, %s127_s9  ;;  %p131_p3 = scmp.lt.u32.totalorder %s127_s9, %s201_s2 }
  0x28   :  { %v44_v4 = vsub.f32 %v40_v0, %v42_v2  ;;  %v45_v5 = vsub.f32 %v41_v1, %v43_v3 }
  0x29   :  { %p133_p4 = pnand %p131_p3, %p128_p2 }
  0x2a   :  { %v46_v6 = vand.u32 2147483647, %v44_v4  ;;  %v47_v7 = vand.u32 2147483647, %v45_v5 }
  0x2c   :  { %v48_v8 = vadd.f32 %v47_v7, %v46_v6 }
  0x2e   :  { %49 = vadd.xlane.f32.xlu0 %v48_v8 }
  0xbb   :  { %v50_v9 = vpop.xlane.xlu0 %49 }
  0xbc   :  { %v51_v10 = vrot.slane %v50_v9, 4 }
  0xbe   :  { %v52_v11 = vadd.f32 %v51_v10, %v50_v9 }
  0xc0   :  { %v53_v12 = vrot.slane %v52_v11, 2 }
  0xc2   :  { %v54_v13 = vadd.f32 %v53_v12, %v52_v11 }
  0xc4   :  { %v55_v14 = vrot.slane %v54_v13, 1 }
  0xc6   :  { %v56_v15 = vadd.f32 %v55_v14, %v54_v13 }
  0xc8   :  { %76 = vpush %v56_v15 }
  0xf9   :  { %s77_s1 = spop %76 }
  0xfa   :  { %s58_s6 = smul.f32 0.00048828125, %s77_s1 }
  0xfc   :  { %60 = sst [smem:[#allocation7]] %s58_s6 }
  0xfd   :  { %136 = shalt.err (!%p133_p4)
}
  0xfe   :  { %s147_s14 = smov [#allocation7]  }
  0xff   :  { %68 = dma.smem_to_hbm %s147_s14, 16, %s201_s2, [#allocation4]  }
 0x100   :  { %141 = dma.done.wait [#allocation4], 16  }
 0x101   :  { %142 = vsyncadd [#allocation4], 4294967280 }
 0x102   :  { %72 = sfence }
 0x103   :  { %73 = vsyncpa [#allocation3], 1 }
 0x104   :  { %74 = vsyncpa [#allocation6], 1 }
 0x105   :  { %75 = vsyncpa [#allocation4], 1 }

</bundles_post_ra>
